<compile_context>
chip_gen: v7x
topology: tpu7x:2x2x1
jax: 0.10.0
libtpu: 0.0.40
codegen_flags: <defaults>
</compile_context>

<pallas_src>
import functools

import jax
import jax.numpy as jnp
import numpy as np
from jax import lax
from jax.experimental import pallas as pl
from jax.experimental.pallas import tpu as pltpu


# ---------------------------------------------------------------------------
# Pixel L1: tiled lane-dense partial-sum reduction
# ---------------------------------------------------------------------------

def _l1_partial_kernel(a_ref, b_ref, o_ref):
    # a_ref/b_ref: (tile_rows, lane) f32 tiles; o_ref: (1, 1, 1) partial sum
    o_ref[0] = jnp.sum(jnp.abs(a_ref[...] - b_ref[...]), keepdims=True)


def l1_loss(a, b):
    """mean(|a - b|)  ==  F.l1_loss(a, b), as a tiled lane-dense reduction."""
    af = a.reshape(-1).astype(jnp.float32)
    bf = b.reshape(-1).astype(jnp.float32)
    n = af.shape[0]

    lane = 512 if n >= 8 * 512 else 128          # lane-dense minor axis
    rows = -(-n // lane)
    rows = -(-rows // 8) * 8                     # sublane multiple of 8
    tile_rows = min(rows, 256)                   # <= 512 KiB / operand / tile
    rows = -(-rows // tile_rows) * tile_rows     # whole number of tiles
    n_pad = rows * lane
    if n_pad != n:
        zeros = jnp.zeros((n_pad - n,), jnp.float32)
        af = jnp.concatenate([af, zeros])
        bf = jnp.concatenate([bf, zeros])
    a2 = af.reshape(rows, lane)
    b2 = bf.reshape(rows, lane)
    steps = rows // tile_rows

    partial = pl.pallas_call(
        _l1_partial_kernel,
        out_shape=jax.ShapeDtypeStruct((steps, 1, 1), jnp.float32),
        grid=(steps,),
        in_specs=[
            pl.BlockSpec((tile_rows, lane), lambda i: (i, 0)),
            pl.BlockSpec((tile_rows, lane), lambda i: (i, 0)),
        ],
        out_specs=pl.BlockSpec((1, 1, 1), lambda i: (i, 0, 0)),
        compiler_params=pltpu.CompilerParams(
            dimension_semantics=("parallel",)),
        cost_estimate=pl.CostEstimate(
            flops=3 * n_pad, transcendentals=0,
            bytes_accessed=8 * n_pad + 4 * steps),
    )(a2, b2)
    return jnp.sum(partial) / jnp.float32(n)


# ---------------------------------------------------------------------------
# Fused per-layer kernel: conv3x3+ReLU (pred & target) + feature L1 + gram L1
# ---------------------------------------------------------------------------

def _feature_layer_kernel(pa_ref, pb_ref, w_ref, b_ref,
                          fa_ref, fb_ref, fl1_ref, gl1_ref, *, gram_scale):
    # pa_ref / pb_ref : (1, ck, hw)  bf16 im2col patches (pred / target)
    # w_ref           : (cout, ck)   bf16 conv weights
    # b_ref           : (cout, 1)    f32 bias
    # fa_ref / fb_ref : (1, cout, hw) f32 features (lane-dense: hw on lanes)
    # fl1_ref/gl1_ref : (1, 1, 1)    per-sample partial sums
    wm = w_ref[...]
    bias = b_ref[...]

    # conv as (cout, ck) @ (ck, hw): bf16 MXU inputs, f32 accumulation,
    # output last dim = hw (multiple of 128) -> dense stores.
    ya = jnp.dot(wm, pa_ref[0], preferred_element_type=jnp.float32)
    yb = jnp.dot(wm, pb_ref[0], preferred_element_type=jnp.float32)
    fa = jnp.maximum(ya + bias, 0.0)             # (cout, hw) f32
    fb = jnp.maximum(yb + bias, 0.0)
    fa_ref[0] = fa
    fb_ref[0] = fb

    # feature-L1 partial sum, reduced while the tiles are still in VMEM
    fl1_ref[0] = jnp.sum(jnp.abs(fa - fb), keepdims=True)

    # gram matrices: contract the hw (lane) axis of both operands directly,
    # no explicit transpose.  Grams never leave VMEM.
    dn = (((1,), (1,)), ((), ()))
    ga = lax.dot_general(fa, fa, dn, preferred_element_type=jnp.float32)
    gb = lax.dot_general(fb, fb, dn, preferred_element_type=jnp.float32)
    gl1_ref[0] = jnp.sum(jnp.abs(ga - gb), keepdims=True) * gram_scale


def _im2col_3x3(x):
    """(n, c, h, w) -> (n, c*9, h*w) patches for a 3x3 'same' convolution.

    Feature index is (channel, tap) with tap = di*3 + dj, matching
    weight.reshape(cout, c*9).  hw stays the minor axis (no 5-D transpose).
    """
    # Note: im2col could be pushed into the kernel as 9 shifted matmuls to cut
    # HBM traffic ~9x at real image sizes; kept as host glue at these shapes.
    n, c, h, w = x.shape
    xp = jnp.pad(x, ((0, 0), (0, 0), (1, 1), (1, 1)))
    cols = [xp[:, :, di:di + h, dj:dj + w]
            for di in range(3) for dj in range(3)]
    patches = jnp.stack(cols, axis=2)            # (n, c, 9, h, w)
    return patches.reshape(n, c * 9, h * w)


def feature_layer(xa, xb, weight, bias):
    """Fused layer op.

    Runs 3x3 same-padding conv + ReLU for pred (xa) and target (xb), returns
    both feature maps (NCHW) plus the layer's feature-L1 mean and gram-L1 mean
    (both unweighted).  weight is PyTorch-layout (cout, cin, 3, 3).
    """
    n, c, h, w = xa.shape
    cout = weight.shape[0]
    hw = h * w
    ck = c * 9

    pa = _im2col_3x3(xa.astype(jnp.float32)).astype(jnp.bfloat16)
    pb = _im2col_3x3(xb.astype(jnp.float32)).astype(jnp.bfloat16)
    wmat = weight.reshape(cout, ck).astype(jnp.bfloat16)
    bvec = bias.reshape(cout, 1).astype(jnp.float32)
    gram_scale = 1.0 / float(cout * h * w)

    flops = n * (2 * 2 * cout * ck * hw          # two conv matmuls
                 + 2 * 2 * cout * cout * hw)     # two gram matmuls
    bytes_accessed = (2 * n * ck * hw * 2        # bf16 patches in
                      + 2 * n * cout * hw * 4    # f32 features out
                      + cout * ck * 2 + cout * 4)

    fa, fb, fpart, gpart = pl.pallas_call(
        functools.partial(_feature_layer_kernel, gram_scale=gram_scale),
        out_shape=(
            jax.ShapeDtypeStruct((n, cout, hw), jnp.float32),
            jax.ShapeDtypeStruct((n, cout, hw), jnp.float32),
            jax.ShapeDtypeStruct((n, 1, 1), jnp.float32),
            jax.ShapeDtypeStruct((n, 1, 1), jnp.float32),
        ),
        grid=(n,),
        in_specs=[
            pl.BlockSpec((1, ck, hw), lambda i: (i, 0, 0)),
            pl.BlockSpec((1, ck, hw), lambda i: (i, 0, 0)),
            pl.BlockSpec((cout, ck), lambda i: (0, 0)),
            pl.BlockSpec((cout, 1), lambda i: (0, 0)),
        ],
        out_specs=(
            pl.BlockSpec((1, cout, hw), lambda i: (i, 0, 0)),
            pl.BlockSpec((1, cout, hw), lambda i: (i, 0, 0)),
            pl.BlockSpec((1, 1, 1), lambda i: (i, 0, 0)),
            pl.BlockSpec((1, 1, 1), lambda i: (i, 0, 0)),
        ),
        compiler_params=pltpu.CompilerParams(
            dimension_semantics=("parallel",)),
        cost_estimate=pl.CostEstimate(
            flops=flops, transcendentals=0, bytes_accessed=bytes_accessed),
    )(pa, pb, wmat, bvec)

    feat_l1 = jnp.sum(fpart) / jnp.float32(n * cout * hw)
    gram_l1 = jnp.sum(gpart) / jnp.float32(n * cout * cout)
    return (fa.reshape(n, cout, h, w), fb.reshape(n, cout, h, w),
            feat_l1, gram_l1)


# ---------------------------------------------------------------------------
# FeatureLoss
# ---------------------------------------------------------------------------

class FeatureLoss:
    """JAX/Pallas port of the PyTorch FeatureLoss forward pass.

    `params` plays the role of m_feat + layer hooks: every conv3x3+ReLU output
    is a hooked feature layer (no pretrained VGG can be loaded in-script).
    """

    def __init__(self, params, layer_wgts):
        self.__name__ = "feat_loss"
        self.params = params
        self.wgts = layer_wgts
        self.metric_names = (
            ["pixel"]
            + [f"feat_{i}" for i in range(len(params))]
            + [f"gram_{i}" for i in range(len(params))]
        )

    def __call__(self, pred, target):
        feat_terms, gram_terms = [], []
        ha, hb = pred, target
        for (w, b) in self.params:
            ha, hb, f_l1, g_l1 = feature_layer(ha, hb, w, b)
            feat_terms.append(f_l1)
            gram_terms.append(g_l1)

        feat_losses = [l1_loss(pred, target)]
        feat_losses += [f * w for f, w in zip(feat_terms, self.wgts)]
        feat_losses += [g * (w ** 2) * 5000.0
                        for g, w in zip(gram_terms, self.wgts)]

        self.feat_losses = feat_losses
        self.metrics = dict(zip(self.metric_names, feat_losses))
        return sum(feat_losses)


# ---------------------------------------------------------------------------
# Pure-JAX reference (sanity check)
# ---------------------------------------------------------------------------

def _ref_conv3x3_relu(x, weight, bias):
    y = jax.lax.conv_general_dilated(
        x.astype(jnp.float32), weight.astype(jnp.float32),
        window_strides=(1, 1), padding="SAME",
        dimension_numbers=("NCHW", "OIHW", "NCHW"))
    return jnp.maximum(y + bias.reshape(1, -1, 1, 1), 0.0)


def _ref_gram(x):
    n, c, h, w = x.shape
    xf = x.reshape(n, c, -1)
    return jnp.einsum("ncl,ndl->ncd", xf, xf) / (c * h * w)


def _ref_loss(pred, target, params, wgts):
    def feats(x):
        out, h = [], x
        for (w, b) in params:
            h = _ref_conv3x3_relu(h, w, b)
            out.append(h)
        return out
    fo, fi = feats(target), feats(pred)
    total = jnp.mean(jnp.abs(pred - target))
    for a, b, w in zip(fi, fo, wgts):
        total = total + jnp.mean(jnp.abs(a - b)) * w
    for a, b, w in zip(fi, fo, wgts):
        total = total + jnp.mean(jnp.abs(_ref_gram(a) - _ref_gram(b))) * (w ** 2) * 5000.0
    return total


# ---------------------------------------------------------------------------
# Main
# ---------------------------------------------------------------------------

if __name__ == "__main__":
    key = jax.random.PRNGKey(0)
    k_pred, k_tgt, k_w1, k_b1, k_w2, k_b2 = jax.random.split(key, 6)

    # small shapes consistent with an image-to-image perceptual loss
    N, C, H, W = 2, 4, 16, 16
    C1, C2 = 8, 8

    pred = jax.random.normal(k_pred, (N, C, H, W), dtype=jnp.float32)
    target = jax.random.normal(k_tgt, (N, C, H, W), dtype=jnp.float32)

    # deterministic synthetic "m_feat" parameters (2 conv+ReLU feature layers)
    params = [
        (0.1 * jax.random.normal(k_w1, (C1, C, 3, 3), dtype=jnp.float32),
         0.01 * jax.random.normal(k_b1, (C1,), dtype=jnp.float32)),
        (0.1 * jax.random.normal(k_w2, (C2, C1, 3, 3), dtype=jnp.float32),
         0.01 * jax.random.normal(k_b2, (C2,), dtype=jnp.float32)),
    ]
    layer_wgts = [0.25, 0.5]

    loss_fn = FeatureLoss(params, layer_wgts)
    loss = jax.block_until_ready(loss_fn(pred, target))

    ref = jax.block_until_ready(_ref_loss(pred, target, params, layer_wgts))
    # bf16 MXU inputs (f32 accumulation) per the perf review => slightly looser
    # tolerance than the pure-f32 reference pipeline.
    np.testing.assert_allclose(np.asarray(loss), np.asarray(ref),
                               rtol=2e-2, atol=1e-3)

    print("KERNEL_OK")
</pallas_src>

<mosaic_0001>
module attributes {stable_mosaic.version = 11 : i64} {
  func.func @_feature_layer_kernel(%arg0: i32, %arg1: memref<1x36x256xbf16, #tpu.memory_space<vmem>>, %arg2: memref<1x36x256xbf16, #tpu.memory_space<vmem>>, %arg3: memref<8x36xbf16, #tpu.memory_space<vmem>>, %arg4: memref<8x1xf32, #tpu.memory_space<vmem>>, %arg5: memref<1x8x256xf32, #tpu.memory_space<vmem>>, %arg6: memref<1x8x256xf32, #tpu.memory_space<vmem>>, %arg7: memref<1x1x1xf32, #tpu.memory_space<vmem>>, %arg8: memref<1x1x1xf32, #tpu.memory_space<vmem>>) attributes {dimension_semantics = [#tpu.dimension_semantics<parallel>], iteration_bounds = array<i64: 2>, scalar_prefetch = 0 : i64, scratch_operands = 0 : i64, tpu.core_type = #tpu.core_type<tc>, window_params = [{transform_indices = @transform_0, window_bounds = array<i64: 1, 36, 256>}, {transform_indices = @transform_1, window_bounds = array<i64: 1, 36, 256>}, {pipeline_mode = #tpu.pipeline_mode<synchronous>, transform_indices = @transform_2, window_bounds = array<i64: 8, 36>}, {pipeline_mode = #tpu.pipeline_mode<synchronous>, transform_indices = @transform_3, window_bounds = array<i64: 8, 1>}, {transform_indices = @transform_4, window_bounds = array<i64: 1, 8, 256>}, {transform_indices = @transform_5, window_bounds = array<i64: 1, 8, 256>}, {transform_indices = @transform_6, window_bounds = array<i64: 1, 1, 1>}, {transform_indices = @transform_7, window_bounds = array<i64: 1, 1, 1>}]} {
    %c0 = arith.constant 0 : index
    %c0_0 = arith.constant 0 : index
    %0 = vector.load %arg3[%c0, %c0_0] : memref<8x36xbf16, #tpu.memory_space<vmem>>, vector<8x36xbf16>
    %c0_1 = arith.constant 0 : index
    %c0_2 = arith.constant 0 : index
    %1 = vector.load %arg4[%c0_1, %c0_2] : memref<8x1xf32, #tpu.memory_space<vmem>>, vector<8x1xf32>
    %c0_3 = arith.constant 0 : index
    %c0_4 = arith.constant 0 : index
    %c0_5 = arith.constant 0 : index
    %2 = vector.load %arg1[%c0_3, %c0_4, %c0_5] : memref<1x36x256xbf16, #tpu.memory_space<vmem>>, vector<1x36x256xbf16>
    %3 = vector.shape_cast %2 : vector<1x36x256xbf16> to vector<36x256xbf16>
    %cst = arith.constant dense<0.000000e+00> : vector<8x256xf32>
    %4 = tpu.matmul %0, %3, %cst {dimension_numbers = #tpu.dot_dimension_numbers<[1], [0], [0], [1], [0, 0, 1, 1], [], []>} : vector<8x36xbf16>, vector<36x256xbf16>, vector<8x256xf32> -> vector<8x256xf32>
    %c0_6 = arith.constant 0 : index
    %c0_7 = arith.constant 0 : index
    %c0_8 = arith.constant 0 : index
    %5 = vector.load %arg2[%c0_6, %c0_7, %c0_8] : memref<1x36x256xbf16, #tpu.memory_space<vmem>>, vector<1x36x256xbf16>
    %6 = vector.shape_cast %5 : vector<1x36x256xbf16> to vector<36x256xbf16>
    %cst_9 = arith.constant dense<0.000000e+00> : vector<8x256xf32>
    %7 = tpu.matmul %0, %6, %cst_9 {dimension_numbers = #tpu.dot_dimension_numbers<[1], [0], [0], [1], [0, 0, 1, 1], [], []>} : vector<8x36xbf16>, vector<36x256xbf16>, vector<8x256xf32> -> vector<8x256xf32>
    %8 = vector.broadcast %1 : vector<8x1xf32> to vector<8x256xf32>
    %9 = arith.addf %4, %8 : vector<8x256xf32>
    %cst_10 = arith.constant 0.000000e+00 : f32
    %10 = vector.broadcast %cst_10 : f32 to vector<8x256xf32>
    %11 = arith.maximumf %9, %10 : vector<8x256xf32>
    %12 = vector.broadcast %1 : vector<8x1xf32> to vector<8x256xf32>
    %13 = arith.addf %7, %12 : vector<8x256xf32>
    %cst_11 = arith.constant 0.000000e+00 : f32
    %14 = vector.broadcast %cst_11 : f32 to vector<8x256xf32>
    %15 = arith.maximumf %13, %14 : vector<8x256xf32>
    %c0_12 = arith.constant 0 : index
    %c0_13 = arith.constant 0 : index
    %c0_14 = arith.constant 0 : index
    %16 = vector.load %arg5[%c0_12, %c0_13, %c0_14] : memref<1x8x256xf32, #tpu.memory_space<vmem>>, vector<1x8x256xf32>
    %17 = vector.shape_cast %16 : vector<1x8x256xf32> to vector<8x256xf32>
    %18 = vector.shape_cast %11 : vector<8x256xf32> to vector<1x8x256xf32>
    tpu.vector_store %arg5[%c0_12, %c0_13, %c0_14], %18 {strides = array<i32>} : memref<1x8x256xf32, #tpu.memory_space<vmem>>, vector<1x8x256xf32>,
    %c0_15 = arith.constant 0 : index
    %c0_16 = arith.constant 0 : index
    %c0_17 = arith.constant 0 : index
    %19 = vector.load %arg6[%c0_15, %c0_16, %c0_17] : memref<1x8x256xf32, #tpu.memory_space<vmem>>, vector<1x8x256xf32>
    %20 = vector.shape_cast %19 : vector<1x8x256xf32> to vector<8x256xf32>
    %21 = vector.shape_cast %15 : vector<8x256xf32> to vector<1x8x256xf32>
    tpu.vector_store %arg6[%c0_15, %c0_16, %c0_17], %21 {strides = array<i32>} : memref<1x8x256xf32, #tpu.memory_space<vmem>>, vector<1x8x256xf32>,
    %22 = arith.subf %11, %15 : vector<8x256xf32>
    %23 = math.absf %22 : vector<8x256xf32>
    %24 = vector.shape_cast %23 : vector<8x256xf32> to vector<1x8x256xf32>
    %cst_18 = arith.constant dense<0.000000e+00> : vector<1xf32>
    %25 = vector.multi_reduction <add>, %24, %cst_18 [1, 2] : vector<1x8x256xf32> to vector<1xf32>
    %26 = vector.shape_cast %25 : vector<1xf32> to vector<1x1x1xf32>
    %27 = vector.extract %26[0, 0, 0] : f32 from vector<1x1x1xf32>
    %28 = vector.broadcast %27 : f32 to vector<1x1xf32>
    %c0_19 = arith.constant 0 : index
    %c0_20 = arith.constant 0 : index
    %c0_21 = arith.constant 0 : index
    %29 = vector.load %arg7[%c0_19, %c0_20, %c0_21] : memref<1x1x1xf32, #tpu.memory_space<vmem>>, vector<1x1x1xf32>
    %30 = vector.shape_cast %29 : vector<1x1x1xf32> to vector<1x1xf32>
    %31 = vector.shape_cast %28 : vector<1x1xf32> to vector<1x1x1xf32>
    tpu.vector_store %arg7[%c0_19, %c0_20, %c0_21], %31 {strides = array<i32>} : memref<1x1x1xf32, #tpu.memory_space<vmem>>, vector<1x1x1xf32>,
    %cst_22 = arith.constant dense<0.000000e+00> : vector<8x8xf32>
    %32 = tpu.matmul %11, %11, %cst_22 {dimension_numbers = #tpu.dot_dimension_numbers<[1], [1], [0], [0], [0, 0, 1, 0], [], []>} : vector<8x256xf32>, vector<8x256xf32>, vector<8x8xf32> -> vector<8x8xf32>
    %cst_23 = arith.constant dense<0.000000e+00> : vector<8x8xf32>
    %33 = tpu.matmul %15, %15, %cst_23 {dimension_numbers = #tpu.dot_dimension_numbers<[1], [1], [0], [0], [0, 0, 1, 0], [], []>} : vector<8x256xf32>, vector<8x256xf32>, vector<8x8xf32> -> vector<8x8xf32>
    %34 = arith.subf %32, %33 : vector<8x8xf32>
    %35 = math.absf %34 : vector<8x8xf32>
    %36 = vector.shape_cast %35 : vector<8x8xf32> to vector<1x8x8xf32>
    %cst_24 = arith.constant dense<0.000000e+00> : vector<1xf32>
    %37 = vector.multi_reduction <add>, %36, %cst_24 [1, 2] : vector<1x8x8xf32> to vector<1xf32>
    %38 = vector.shape_cast %37 : vector<1xf32> to vector<1x1x1xf32>
    %39 = vector.extract %38[0, 0, 0] : f32 from vector<1x1x1xf32>
    %40 = vector.broadcast %39 : f32 to vector<1x1xf32>
    %cst_25 = arith.constant 4.8828125E-4 : f32
    %41 = vector.broadcast %cst_25 : f32 to vector<1x1xf32>
    %42 = arith.mulf %40, %41 : vector<1x1xf32>
    %c0_26 = arith.constant 0 : index
    %c0_27 = arith.constant 0 : index
    %c0_28 = arith.constant 0 : index
    %43 = vector.load %arg8[%c0_26, %c0_27, %c0_28] : memref<1x1x1xf32, #tpu.memory_space<vmem>>, vector<1x1x1xf32>
    %44 = vector.shape_cast %43 : vector<1x1x1xf32> to vector<1x1xf32>
    %45 = vector.shape_cast %42 : vector<1x1xf32> to vector<1x1x1xf32>
    tpu.vector_store %arg8[%c0_26, %c0_27, %c0_28], %45 {strides = array<i32>} : memref<1x1x1xf32, #tpu.memory_space<vmem>>, vector<1x1x1xf32>,
    return
  }
  func.func @transform_0(%arg0: i32) -> (i32, i32, i32) {
    %c0_i32 = arith.constant 0 : i32
    %c0_i32_0 = arith.constant 0 : i32
    %c0_i32_1 = arith.constant 0 : i32
    return %arg0, %c0_i32, %c0_i32_0 : i32, i32, i32
  }
  func.func @transform_1(%arg0: i32) -> (i32, i32, i32) {
    %c0_i32 = arith.constant 0 : i32
    %c0_i32_0 = arith.constant 0 : i32
    %c0_i32_1 = arith.constant 0 : i32
    return %arg0, %c0_i32, %c0_i32_0 : i32, i32, i32
  }
  func.func @transform_2(%arg0: i32) -> (i32, i32) {
    %c0_i32 = arith.constant 0 : i32
    %c0_i32_0 = arith.constant 0 : i32
    %c0_i32_1 = arith.constant 0 : i32
    return %c0_i32, %c0_i32_0 : i32, i32
  }
  func.func @transform_3(%arg0: i32) -> (i32, i32) {
    %c0_i32 = arith.constant 0 : i32
    %c0_i32_0 = arith.constant 0 : i32
    %c0_i32_1 = arith.constant 0 : i32
    return %c0_i32, %c0_i32_0 : i32, i32
  }
  func.func @transform_4(%arg0: i32) -> (i32, i32, i32) {
    %c0_i32 = arith.constant 0 : i32
    %c0_i32_0 = arith.constant 0 : i32
    %c0_i32_1 = arith.constant 0 : i32
    return %arg0, %c0_i32, %c0_i32_0 : i32, i32, i32
  }
  func.func @transform_5(%arg0: i32) -> (i32, i32, i32) {
    %c0_i32 = arith.constant 0 : i32
    %c0_i32_0 = arith.constant 0 : i32
    %c0_i32_1 = arith.constant 0 : i32
    return %arg0, %c0_i32, %c0_i32_0 : i32, i32, i32
  }
  func.func @transform_6(%arg0: i32) -> (i32, i32, i32) {
    %c0_i32 = arith.constant 0 : i32
    %c0_i32_0 = arith.constant 0 : i32
    %c0_i32_1 = arith.constant 0 : i32
    return %arg0, %c0_i32, %c0_i32_0 : i32, i32, i32
  }
  func.func @transform_7(%arg0: i32) -> (i32, i32, i32) {
    %c0_i32 = arith.constant 0 : i32
    %c0_i32_0 = arith.constant 0 : i32
    %c0_i32_1 = arith.constant 0 : i32
    return %arg0, %c0_i32, %c0_i32_0 : i32, i32, i32
  }
}

</mosaic_0001>

<bundles_post_ra>
// kernel: tpu_custom_call.1
= control target key start
LH: loop header
LB: loop body
LE: loop exit
PB: predicated region body
PF: predicated region fallthrough
CT: control target
= control target key end

     0   :  { %s1256_s0 = inlined_call_operand.vmem [shape: bf16[2,36,256], index: 0, kind: input, shape index: {}]   ;;  %s1257_s1 = inlined_call_operand.vmem [shape: bf16[2,36,256], index: 1, kind: input, shape index: {}]   ;;  %s1258_s2 = inlined_call_operand.vmem [shape: bf16[8,36], index: 2, kind: input, shape index: {}]   ;;  %s1259_s3 = inlined_call_operand.vmem [shape: f32[8,1], index: 3, kind: input, shape index: {}]   ;;  %s1260_s4 = inlined_call_operand.hbm [shape: f32[2,8,256], index: 4, kind: output, shape index: {0}]   ;;  %s1261_s5 = inlined_call_operand.hbm [shape: f32[2,8,256], index: 5, kind: output, shape index: {1}]   ;;  %s1262_s6 = inlined_call_operand.vmem [shape: f32[2,1,1], index: 6, kind: output, shape index: {2}]   ;;  %s1263_s7 = inlined_call_operand.vmem [shape: f32[2,1,1], index: 7, kind: output, shape index: {3}]  }
   0x1   :  { %1265 = sst [smem:[#allocation8_spill]] %s1256_s0 }
   0x2   :  { %1266 = sst [smem:[#allocation9_spill]] %s1257_s1 }
   0x3   :  { %13 = vsyncpa [#allocation3], 0 }
   0x4   :  { %15 = vsyncpa [#allocation3 + $0x1], 0 }
   0x5   :  { %16 = vsyncpa [#allocation5], 0 }
   0x6   :  { %18 = vsyncpa [#allocation5 + $0x1], 0  ;;  %s1099_s24 = smov 0   ;;  %s1101_s25 = smov 0  }
   0x7   :  { %s1103_s26 = smov 0   ;;  %s1105_s27 = smov 0  }
   0x8 LB: > { %s1120_s28 = sadd.s32 4294967295, %s1054_s27   ;;  %s859_s29 = sadd.s32 4294967294, %s1054_s27   ;;  %s1054_s27 = sphi %s1105_s27, %s1275_s27   ;;  %s1050_s26 = sphi %s1103_s26, %s1274_s26   ;;  %s1046_s25 = sphi %s1101_s25, %s1273_s25   ;;  %s1042_s24 = sphi %s1099_s24, %s1272_s24  }
   0x9   : > { %s1124_s30 = sadd.s32 1, %s1054_s27   ;;  %s125_s8 = sadd.s32 1, %s1050_s26 }
   0xa   : > { %s122_s9 = ssub.s32 %s1054_s27, %s1124_s30  ;;  %p135_p0 = scmp.ne.s32.totalorder %s1050_s26, %s1046_s25 }
   0xb   : > { %p123_p1 = scmp.eq.s32.totalorder %s122_s9, 0  ;;  %p136_p2 = scmp.eq.s32.totalorder %s1120_s28, 1 }
   0xc   : > { %p141_p3 = scmp.ne.s32.totalorder %s1046_s25, %s1042_s24  ;;  %p142_p4 = scmp.eq.s32.totalorder %s859_s29, 1 }
   0xd   : > { %s1135_s10 = scalar_select %p123_p1, %s1050_s26, %s125_s8  }
   0xe   : > { %p1137_p5 = por %p136_p2, %p135_p0  ;;  %p1141_p6 = por %p142_p4, %p141_p3 }
   0xf   : > { %p862_p7 = scmp.ge.s32.totalorder %s1054_s27, 1  ;;  %p260_p8 = scmp.lt.s32.totalorder %s1054_s27, 3 }
  0x11   : > { %p261_p9 = pnand %p862_p7, %p260_p8 }
  0x12   : > { %p308_p10 = scmp.lt.s32.totalorder (!%p261_p9), %s1120_s28, 1  ;;  %v1056_v0 = vmov (!%p261_p9), 0   ;;  %v326_v1 = vld [vmem:[%s1259_s3] sm:$0xff] (!%p261_p9)  ;;  %s1269_s0 = sld [smem:[#allocation8_spill]] (!%p261_p9)  ;;  %vm371_vm0 = vcmask (!%p261_p9), 1041408   ;;  %vm367_vm1 = vcmask (!%p261_p9), 293888  }
  0x13   : > { %264 = sbr.rel (%p261_p9) target bundleno = 691 (0x2b3), region = 36  ;;  %410 = vmatprep.mubr.bf16.mxu0 (!%p261_p9), %v1056_v0  ;;  %484 = vmatprep.mubr.bf16.mxu1 (!%p261_p9), %v1056_v0  ;;  %s1270_s1 = sld [smem:[#allocation9_spill]] (!%p261_p9)  ;;  %v325_v18 = vld [vmem:[%s1258_s2] sm:$0xf] (!%p261_p9)  ;;  %vm514_vm2 = vcmask (!%p261_p9), 0   ;;  %vm658_vm3 = vcmask (!%p261_p9), 64512  }
  0x14   : > { %943 = vset.pattern.permute.xlu0 (!%p261_p9), %v1056_v0  ;;  %s1165_s8 = sand.u32 (!%p261_p9), 1, %s1046_s25   ;;  %s1264_s20 = sshll.u32 (!%p261_p9), %s1120_s28, 8 }
  0x15   : > { %339 = vperm.xlu0 (!%p261_p9), %943, %v326_v1   ;;  %s863_s9 = sshll.u32 (!%p261_p9), %s1165_s8, 4  ;;  %s1188_s29 = scalar_lea.hbm (!%p261_p9), %s1260_s4, %s1264_s20 }
  0x16   : > { %s1168_s13 = scalar_lea.vmem (!%p261_p9), [#allocation2], %s863_s9  ;;  %s1171_s14 = scalar_lea.vmem (!%p261_p9), [#allocation4], %s863_s9 }
  0x17   : > { %s698_s21 = sshll.u32 (!%p261_p9), %s1168_s13, 4  ;;  %s673_s9 = scalar_lea.sflag (!%p261_p9), [#allocation3], %s1165_s8  ;;  %s699_s21 = int_to_ptr.vmem [resolvable:$true] %s698_s21 }
  0x18   : > { %s1057_s17 = smov (!%p261_p9), [#allocation2]  }
  0x1a   : > { %s1152_s15 = scalar_select %p308_p10, %s1120_s28, 1 }
  0x1c   : > { %s893_s16 = smul.u32 40, %s1152_s15  ;;  %s320_s18 = scalar_lea.vmem %s1262_s6, %s1152_s15 }
  0x1e   : > { %s312_s19 = scalar_lea.vmem %s1269_s0, %s893_s16  ;;  %s317_s22 = scalar_lea.vmem %s1270_s1, %s893_s16 }
  0x1f   : > { %v944_v2 = vld [vmem:[%s312_s19 + $0x4] ss:$8 sps:$4 sm:$0xff]   ;;  %v948_v4 = vld [vmem:[%s312_s19] ss:$8 sps:$4 sm:$0xff]   ;;  %v950_v6 = vld [vmem:[%s312_s19 + $0x14] ss:$8 sps:$4 sm:$0xff]  }
  0x20   : > { %v946_v3 = vld [vmem:[%s317_s22 + $0x4] ss:$8 sps:$4 sm:$0xff]   ;;  %378 = vmatprep.subr.bf16.mxu0 %v944_v2  ;;  %v949_v5 = vld [vmem:[%s317_s22] ss:$8 sps:$4 sm:$0xff]   ;;  %v952_v7 = vld [vmem:[%s317_s22 + $0x14] ss:$8 sps:$4 sm:$0xff]  }
  0x21   : > { %452 = vmatprep.subr.bf16.mxu1 %v946_v3  ;;  %379 = vmatpush1.bf16.msra.mxu0 %v948_v4  ;;  %v954_v8 = vld [vmem:[%s312_s19 + $0x10] ss:$8 sps:$4 sm:$0xff]   ;;  %v331_v10 = vld [vmem:[%s312_s19 + $0x20] sm:$0x33]  ;;  %s960_s16 = scalar_lea.vmem %s699_s21, 256 }
  0x22   : > { %453 = vmatpush1.bf16.msra.mxu1 %v949_v5  ;;  %380 = vmatprep.subr.bf16.mxu0 %v950_v6  ;;  %v955_v9 = vld [vmem:[%s317_s22 + $0x10] ss:$8 sps:$4 sm:$0xff]   ;;  %v336_v11 = vld [vmem:[%s317_s22 + $0x20] sm:$0x33]  ;;  %v872_v12 = vcombine.high %v331_v10, %v331_v10  ;;  %v871_v14 = vcombine.low %v331_v10, %v331_v10  ;;  %p961_p11 = scmp.ne.s32.totalorder %s699_s21, %s960_s16 }
  0x23   : > { %454 = vmatprep.subr.bf16.mxu1 %v952_v7  ;;  %v880_v13 = vcombine.high %v336_v11, %v336_v11  ;;  %v879_v15 = vcombine.low %v336_v11, %v336_v11 }
  0x24   : > { %v373_v16 = vsel %vm371_vm0, %v871_v14, 0  ;;  %p962_p12 = pnand %p961_p11, %p1137_p5 }
  0x25   : > { %381 = vmatpush1.bf16.msra.mxu0 %v954_v8  ;;  %v447_v17 = vsel %vm371_vm0, %v879_v15, 0 }
  0x26   : > { %455 = vmatpush1.bf16.msra.mxu1 %v955_v9  ;;  %873 = vmatprep.subr.msk.bf16.mxu0 %vm371_vm0, %v872_v12  ;;  %p963_p13 = pneg %p962_p12 }
  0x27   : > { %881 = vmatprep.subr.msk.bf16.mxu1 %vm371_vm0, %v880_v13 }
  0x29   : > { %383 = vmatpush1.bf16.msra.mxu0 %v373_v16 }
  0x2a   : > { %457 = vmatpush1.bf16.msra.mxu1 %v447_v17 }
  0x2c   : > { %874 = vmatmul.mubr.msk.bf16.vlgmr.msra.gmra.mrb[0].mxu0 %vm367_vm1, %v325_v18 }
  0x2d   : > { %882 = vmatmul.mubr.msk.bf16.vlgmr.msra.gmra.mrb[0].mxu1 %vm367_vm1, %v325_v18 }
  0x94   : > { %v340_v19 = vpop.permute.xlu0 %339 }
  0xff   : > { %v412_v20 = vpop.f32.mrb[0].mxu0 }
 0x100   : > { %v486_v21 = vpop.f32.mrb[0].mxu1  ;;  %v413_v22 = vadd.f32 %v412_v20, %v340_v19  ;;  %v414_v24 = vpop.f32.mrb[1].mxu0 }
 0x101   : > { %v487_v23 = vadd.f32 %v486_v21, %v340_v19  ;;  %v488_v25 = vpop.f32.mrb[1].mxu1  ;;  %v415_v26 = vadd.f32 %v414_v24, %v340_v19  ;;  %v416_v28 = vpop.f32.mrb[2].mxu0 }
 0x102   : > { %v489_v27 = vadd.f32 %v488_v25, %v340_v19  ;;  %v490_v29 = vpop.f32.mrb[2].mxu1  ;;  %v419_v30 = vmax.f32 %v413_v22, 0.0  ;;  %v417_v32 = vpop.f32.mrb[3].mxu0 }
 0x103   : > { %v493_v31 = vmax.f32 %v487_v23, 0.0  ;;  %v491_v33 = vpop.f32.mrb[3].mxu1  ;;  %v420_v34 = vmax.f32 %v415_v26, 0.0 }
 0x104   : > { %v494_v35 = vmax.f32 %v489_v27, 0.0  ;;  %495 = vst [vmem:[%s1168_s13] sm:$0xff] %v419_v30 }
 0x105   : > { %v499_v36 = vsub.f32 %v419_v30, %v493_v31  ;;  %497 = vst [vmem:[%s1171_s14] sm:$0xff] %v493_v31  ;;  %516 = vmatprep.subr.mxu0 %v420_v34  ;;  %580 = vmatprep.mubr.f32.mxu0 %v420_v34  ;;  %496 = vst [vmem:[%s1168_s13 + $0x8] sm:$0xff] %v420_v34 }
 0x106   : > { %v500_v37 = vsub.f32 %v420_v34, %v494_v35  ;;  %498 = vst [vmem:[%s1171_s14 + $0x8] sm:$0xff] %v494_v35  ;;  %586 = vmatprep.subr.mxu1 %v494_v35  ;;  %650 = vmatprep.mubr.f32.mxu1 %v494_v35 }
 0x107   : > { %v501_v38 = vand.u32 2147483647, %v499_v36  ;;  %517 = vmatpush1.xpose.msra.mxu0 %v419_v30  ;;  %587 = vmatpush1.xpose.msra.mxu1 %v493_v31 }
 0x108   : > { %v502_v39 = vand.u32 2147483647, %v500_v37 }
 0x10a   : > { %v503_v40 = vadd.f32 %v502_v39, %v501_v38  ;;  %581 = vmatmul.mubr.f32.vlgmr.msra.gmra.mrb[4].mxu0 %v419_v30  ;;  %651 = vmatmul.mubr.f32.vlgmr.msra.gmra.mrb[4].mxu1 %v493_v31 }
 0x10c   : > { %504 = vadd.xlane.f32.xlu0 %v503_v40 }
 0x199   : > { %v505_v41 = vpop.xlane.xlu0 %504 }
 0x19a   : > { %v506_v42 = vrot.slane %v505_v41, 4 }
 0x19c   : > { %v507_v43 = vadd.f32 %v506_v42, %v505_v41 }
 0x19e   : > { %v508_v44 = vrot.slane %v507_v43, 2 }
 0x1a0   : > { %v509_v45 = vadd.f32 %v508_v44, %v507_v43 }
 0x1a2   : > { %v510_v46 = vrot.slane %v509_v45, 1 }
 0x1a4   : > { %v511_v47 = vadd.f32 %v510_v46, %v509_v45 }
 0x1a6   : > { %894 = vpush %v511_v47 }
 0x1d7   : > { %s895_s19 = spop %894 }
 0x1d8   : > { %v513_v48 = vstv %s895_s19 }
 0x1d9   : > { %515 = vst.msk [vmem:[%s320_s18] sm:$0x1] %vm514_vm2, %v513_v48  ;;  %s964_s18 = sshll.u32 %s1057_s17, 4  ;;  %s965_s18 = int_to_ptr.vmem [resolvable:$false] %s964_s18 }
 0x1da   : > { %s966_s19 = scalar_lea.vmem %s965_s18, 512  ;;  %p967_p0 = scmp.lt.s32.totalorder %s699_s21, %s965_s18 }
 0x1db   : > { %p968_p1 = scmp.lt.s32.totalorder %s966_s19, %s960_s16 }
 0x1dd   : > { %v582_v49 = vpop.f32.mrb[4].mxu0  ;;  %v652_v50 = vpop.f32.mrb[4].mxu1  ;;  %p969_p2 = por %p968_p1, %p967_p0 }
 0x1de   : > { %v656_v51 = vsub.f32 %v582_v49, %v652_v50  ;;  %v584_v52 = vpop.f32.mrb[5].mxu0  ;;  %v654_v53 = vpop.f32.mrb[5].mxu1 }
 0x1df   : > { %p970_p3 = pnand %p969_p2, %p963_p13 }
 0x1e0   : > { %v657_v54 = vand.u32 2147483647, %v656_v51 }
 0x1e2   : > { %v659_v55 = vsel %vm658_vm3, %v657_v54, 0.0 }
 0x1e3   : > { %660 = vadd.xlane.f32.xlu1 %v659_v55 }
 0x1e4   : > { %973 = shalt.err (!%p970_p3)
}
 0x1e5   : > { %s974_s13 = scalar_lea.hbm %s1188_s29, 256  ;;  %s978_s17 = scalar_lea.hbm %s1260_s4, 512 }
 0x1e6   : > { %p975_p4 = scmp.ne.s32.totalorder %s1188_s29, %s974_s13  ;;  %p979_p9 = scmp.lt.u32.totalorder %s1188_s29, %s1260_s4 }
 0x1e7   : > { %p980_p10 = scmp.lt.u32.totalorder %s978_s17, %s974_s13  ;;  %p982_p12 = scmp.lt.u32.totalorder %s974_s13, %s1188_s29 }
 0x1e8   : > { %p976_p7 = pnand %p975_p4, %p1137_p5 }
 0x1e9   : > { %p981_p11 = por %p980_p10, %p979_p9 }
 0x1ea   : > { %p977_p8 = pneg %p976_p7 }
 0x1eb   : > { %p983_p13 = por %p982_p12, %p981_p11 }
 0x1ed   : > { %p984_p0 = pnand %p983_p13, %p977_p8 }
 0x1ef   : > { %987 = shalt.err (!%p984_p0)
}
 0x1f0   : > { %898 = dma.vmem_to_hbm [thread:$0]  (%p1137_p5), %s699_s21, 256, %s1188_s29, %s673_s9  }
 0x1f1   : > { %s1271_s16 = sshll.u32 %s1120_s28, 8  ;;  %s712_s23 = sshll.u32 %s1171_s14, 4  ;;  %s713_s23 = int_to_ptr.vmem [resolvable:$true] %s712_s23 }
 0x1f2   : > { %s1213_s20 = scalar_lea.hbm %s1261_s5, %s1271_s16  ;;  %s678_s13 = scalar_lea.sflag [#allocation5], %s1165_s8 }
 0x1f3   : > { %s988_s17 = scalar_lea.vmem %s713_s23, 256  ;;  %s1058_s18 = smov [#allocation4]  }
 0x1f4   : > { %p989_p1 = scmp.ne.s32.totalorder %s713_s23, %s988_s17  ;;  %s992_s0 = sshll.u32 %s1058_s18, 4  ;;  %s993_s0 = int_to_ptr.vmem [resolvable:$false] %s992_s0 }
 0x1f5   : > { %s994_s1 = scalar_lea.vmem %s993_s0, 512  ;;  %p995_p4 = scmp.lt.s32.totalorder %s713_s23, %s993_s0 }
 0x1f6   : > { %p990_p2 = pnand %p989_p1, %p1137_p5  ;;  %p996_p7 = scmp.lt.s32.totalorder %s994_s1, %s988_s17 }
 0x1f8   : > { %p991_p3 = pneg %p990_p2  ;;  %p997_p8 = por %p996_p7, %p995_p4 }
 0x1fa   : > { %p998_p9 = pnand %p997_p8, %p991_p3 }
 0x1fc   : > { %1001 = shalt.err (!%p998_p9)
}
 0x1fd   : > { %s1002_s28 = scalar_lea.hbm %s1213_s20, 256  ;;  %s1006_s21 = scalar_lea.hbm %s1261_s5, 512 }
 0x1fe   : > { %p1003_p10 = scmp.ne.s32.totalorder %s1213_s20, %s1002_s28  ;;  %p1007_p13 = scmp.lt.u32.totalorder %s1213_s20, %s1261_s5 }
 0x1ff   : > { %p1008_p0 = scmp.lt.u32.totalorder %s1006_s21, %s1002_s28  ;;  %p1010_p2 = scmp.lt.u32.totalorder %s1002_s28, %s1213_s20 }
 0x200   : > { %p1004_p11 = pnand %p1003_p10, %p1137_p5 }
 0x201   : > { %p1009_p1 = por %p1008_p0, %p1007_p13 }
 0x202   : > { %p1005_p12 = pneg %p1004_p11 }
 0x203   : > { %p1011_p3 = por %p1010_p2, %p1009_p1 }
 0x205   : > { %p1012_p4 = pnand %p1011_p3, %p1005_p12 }
 0x207   : > { %1015 = shalt.err (!%p1012_p4)
}
 0x208   : > { %899 = dma.vmem_to_hbm [thread:$0]  (%p1137_p5), %s713_s23, 256, %s1213_s20, %s678_s13  }
 0x209   : > { %s323_s19 = scalar_lea.vmem %s1263_s7, %s1152_s15 }
 0x270   : > { %v661_v56 = vpop.xlane.xlu1 %660 }
 0x271   : > { %v662_v57 = vrot.slane %v661_v56, 4 }
 0x273   : > { %v663_v58 = vadd.f32 %v662_v57, %v661_v56 }
 0x275   : > { %v664_v59 = vrot.slane %v663_v58, 2 }
 0x277   : > { %v665_v60 = vadd.f32 %v664_v59, %v663_v58 }
 0x279   : > { %v666_v61 = vrot.slane %v665_v60, 1 }
 0x27b   : > { %v667_v62 = vadd.f32 %v666_v61, %v665_v60 }
 0x27d   : > { %896 = vpush %v667_v62 }
 0x2ae   : > { %s897_s1 = spop %896 }
 0x2af   : > { %v669_v63 = vstv %s897_s1 }
 0x2b0   : > { %v670_v0 = vmul.f32 0.00048828125, %v669_v63 }
 0x2b2   : > { %671 = vst.msk [vmem:[%s323_s19] sm:$0x1] %vm514_vm2, %v670_v0 }
 0x2b3 PF: > { %p909_p5 = scmp.ge.s32.totalorder %s1054_s27, 2  ;;  %s730_s11 = sand.u32 1, %s1042_s24  }
 0x2b4   : > { %s731_s22 = scalar_lea.sflag [#allocation3], %s730_s11 }
 0x2b5   : > { %p903_p7 = pnand %p909_p5, %p1141_p6 }
 0x2b7   : > { %1033 = dma.done.wait (!%p903_p7), %s731_s22, 256  }
 0x2b8   : > { %1035 = vsyncadd (!%p903_p7), %s731_s22, 4294967040  ;;  %s740_s20 = scalar_lea.sflag [#allocation5], %s730_s11 }
 0x2b9   : > { %1037 = dma.done.wait (!%p903_p7), %s740_s20, 256  }
 0x2ba   : > { %1039 = vsyncadd (!%p903_p7), %s740_s20, 4294967040  ;;  %p21_p8 = scmp.ge.s32.totalorder %s1124_s30, 4   ;;  %s1272_s24 = smov %s1046_s25 }
 0x2bb   : > { %s1273_s25 = smov %s1050_s26  ;;  %s1274_s26 = smov %s1135_s10 }
 0x2bc   : > { %s1275_s27 = smov %s1124_s30  ;;  %23 = sbr.rel (!%p21_p8) target bundleno = 8 (0x8), region = 115 }
 0x2c3   :  { %757 = vsyncpa [#allocation3], 1 }
 0x2c4   :  { %759 = vsyncpa [#allocation3 + $0x1], 1 }
 0x2c5   :  { %760 = vsyncpa [#allocation5], 1 }
 0x2c6   :  { %762 = vsyncpa [#allocation5 + $0x1], 1 }

</bundles_post_ra>
